<compile_context>
chip_gen: v7x
topology: tpu7x:2x2x1
jax: 0.10.0
libtpu: 0.0.40
codegen_flags: <defaults>
</compile_context>

<pallas_src>
import jax
import jax.numpy as jnp
from jax.experimental import pallas as pl
from jax.experimental.pallas import tpu as pltpu

_SUBLANE = 8
_ROW_TILE = 1024  # row block used once B*M gets large (multiple of 8)


def _round_up(a: int, b: int) -> int:
    return pl.cdiv(a, b) * b


def make_forward(negative_slope: float, weight):
    """Build a jitted forward(x) closing over a once-prepared weight."""
    ns = float(negative_slope)
    w = jnp.asarray(weight, dtype=jnp.float32)
    N, D = w.shape
    assert N == D, "where() requires out_features == in_features (see NOTE)"

    # Construction-time weight prep (done once, not per call):
    #   transpose -> (D, N) so the kernel needs no in-kernel transpose,
    #   cast -> bf16 so the MXU runs native bf16.
    w_t_bf16 = jnp.asarray(w.T, dtype=jnp.bfloat16)  # (D, N)

    def kernel(x_ref, w_ref, o_ref):
        x = x_ref[...]                                   # (tm, D) f32
        wt = w_ref[...]                                  # (D, N) bf16, resident
        # v1 = x @ W.T  (MXU, bf16 operands, f32 accumulate)
        v1 = jnp.dot(x.astype(jnp.bfloat16), wt,
                     preferred_element_type=jnp.float32)  # (tm, N)
        if ns == 1.0:
            out = v1                                     # where(c, v1, v1*1) == v1
        else:
            # relu(x) == 0  <=>  x <= 0  (incl. -0.0; NaN -> False, same as torch)
            out = jnp.where(x <= 0.0, v1, v1 * ns)       # requires N == D
        o_ref[...] = out.astype(o_ref.dtype)

    @jax.jit
    def forward(x):
        B, M, Dx = x.shape
        assert Dx == D, "feature dim mismatch with weight"
        rows = B * M
        x2 = x.reshape(rows, D)                          # contiguous merge, free

        # Row tile: >= 2 sublane-aligned blocks whenever rows allow (v7x
        # megacore), capped at _ROW_TILE; otherwise one full-extent block.
        two_block_tm = _round_up(pl.cdiv(rows, 2), _SUBLANE)
        if two_block_tm >= rows:
            tm = rows                                    # single block == array
        else:
            tm = min(_ROW_TILE, two_block_tm)
        grid = (pl.cdiv(rows, tm),)

        out = pl.pallas_call(
            kernel,
            out_shape=jax.ShapeDtypeStruct((rows, N), x.dtype),
            grid=grid,
            in_specs=[
                pl.BlockSpec((tm, D), lambda i: (i, 0)),  # row tile of x
                pl.BlockSpec((D, N), lambda i: (0, 0)),   # weight, resident
            ],
            out_specs=pl.BlockSpec((tm, N), lambda i: (i, 0)),
            compiler_params=pltpu.CompilerParams(
                dimension_semantics=("parallel",)),
        )(x2, w_t_bf16)

        return out.reshape(B, M, N)

    return forward


def _reference(x, w, slope):
    v1 = jnp.einsum("bmd,nd->bmn", x, w)
    return jnp.where(jnp.maximum(x, 0.0) == 0.0, v1, v1 * slope)


if __name__ == "__main__":
    negative_slope = 1  # module default
    B, M, D = 1, 12, 12  # in_features == out_features == 12 (see NOTE above)

    key = jax.random.PRNGKey(0)
    kx, kw = jax.random.split(key)
    x1 = jax.random.normal(kx, (B, M, D), dtype=jnp.float32)   # ~ torch.randn
    W = jax.random.uniform(kw, (D, D), dtype=jnp.float32)      # ~ torch.rand

    # bf16 MXU operands -> loosened tolerance vs f32 reference (per review).
    TOL = dict(atol=5e-2, rtol=5e-2)

    # Module configuration (negative_slope == 1): short-circuit path.
    fwd1 = make_forward(negative_slope, W)
    out = fwd1(x1)
    jax.block_until_ready(out)
    ref = _reference(x1, W, negative_slope)
    assert out.shape == (B, M, D)
    assert jnp.allclose(out, ref, **TOL)

    # slope != 1 exercises the where()/select path.
    fwd2 = make_forward(0.01, W)
    out2 = fwd2(x1)
    jax.block_until_ready(out2)
    ref2 = _reference(x1, W, 0.01)
    assert jnp.allclose(out2, ref2, **TOL)

    # Larger batch exercises the multi-block grid + non-divisible last block.
    xl = jax.random.normal(key, (2, 1500, D), dtype=jnp.float32)
    out3 = fwd2(xl)
    jax.block_until_ready(out3)
    ref3 = _reference(xl, W, 0.01)
    assert out3.shape == (2, 1500, D)
    assert jnp.allclose(out3, ref3, **TOL)

    print("KERNEL_OK")
</pallas_src>

<mosaic_0001>
module attributes {stable_mosaic.version = 11 : i64} {
  func.func @kernel(%arg0: i32, %arg1: memref<8x12xf32, #tpu.memory_space<vmem>>, %arg2: memref<12x12xbf16, #tpu.memory_space<vmem>>, %arg3: memref<8x12xf32, #tpu.memory_space<vmem>>) attributes {dimension_semantics = [#tpu.dimension_semantics<parallel>], iteration_bounds = array<i64: 2>, scalar_prefetch = 0 : i64, scratch_operands = 0 : i64, tpu.core_type = #tpu.core_type<tc>, window_params = [{transform_indices = @transform_0, window_bounds = array<i64: 8, 12>}, {pipeline_mode = #tpu.pipeline_mode<synchronous>, transform_indices = @transform_1, window_bounds = array<i64: 12, 12>}, {transform_indices = @transform_2, window_bounds = array<i64: 8, 12>}]} {
    %c0 = arith.constant 0 : index
    %c0_0 = arith.constant 0 : index
    %0 = vector.load %arg1[%c0, %c0_0] : memref<8x12xf32, #tpu.memory_space<vmem>>, vector<8x12xf32>
    %c0_1 = arith.constant 0 : index
    %c0_2 = arith.constant 0 : index
    %1 = vector.load %arg2[%c0_1, %c0_2] : memref<12x12xbf16, #tpu.memory_space<vmem>>, vector<12x12xbf16>
    %2 = arith.truncf %0 : vector<8x12xf32> to vector<8x12xbf16>
    %cst = arith.constant dense<0.000000e+00> : vector<8x12xf32>
    %3 = tpu.matmul %2, %1, %cst {dimension_numbers = #tpu.dot_dimension_numbers<[1], [0], [0], [1], [0, 0, 1, 1], [], []>} : vector<8x12xbf16>, vector<12x12xbf16>, vector<8x12xf32> -> vector<8x12xf32>
    %c0_3 = arith.constant 0 : index
    %c0_4 = arith.constant 0 : index
    %4 = vector.load %arg3[%c0_3, %c0_4] : memref<8x12xf32, #tpu.memory_space<vmem>>, vector<8x12xf32>
    tpu.vector_store %arg3[%c0_3, %c0_4], %3 {strides = array<i32>} : memref<8x12xf32, #tpu.memory_space<vmem>>, vector<8x12xf32>,
    return
  }
  func.func @transform_0(%arg0: i32) -> (i32, i32) {
    %c0_i32 = arith.constant 0 : i32
    %c0_i32_0 = arith.constant 0 : i32
    return %arg0, %c0_i32 : i32, i32
  }
  func.func @transform_1(%arg0: i32) -> (i32, i32) {
    %c0_i32 = arith.constant 0 : i32
    %c0_i32_0 = arith.constant 0 : i32
    %c0_i32_1 = arith.constant 0 : i32
    return %c0_i32, %c0_i32_0 : i32, i32
  }
  func.func @transform_2(%arg0: i32) -> (i32, i32) {
    %c0_i32 = arith.constant 0 : i32
    %c0_i32_0 = arith.constant 0 : i32
    return %arg0, %c0_i32 : i32, i32
  }
}

</mosaic_0001>

<bundles_post_ra>
// kernel: forward.1
= control target key start
LH: loop header
LB: loop body
LE: loop exit
PB: predicated region body
PF: predicated region fallthrough
CT: control target
= control target key end

     0   :  { %s306_s9 = smov 0   ;;  %s326_s0 = inlined_call_operand.vmem [shape: f32[12,12], index: 0, kind: input, shape index: {}]   ;;  %s327_s1 = inlined_call_operand.vmem [shape: bf16[12,12], index: 1, kind: input, shape index: {}]   ;;  %s328_s2 = inlined_call_operand.vmem [shape: f32[12,12], index: 2, kind: output, shape index: {}]  }
   0x1 LB: > { %s251_s10 = sadd.s32 4294967295, %s287_s9   ;;  %p255_p0 = scmp.ge.s32.totalorder %s287_s9, 1  ;;  %s287_s9 = sphi %s306_s9, %s12_s9  }
   0x2   : > { %p111_p1 = scmp.lt.s32.totalorder %s287_s9, 3 }
   0x4   : > { %p112_p2 = pnand %p255_p0, %p111_p1 }
   0x5   : > { %vm153_vm0 = vcmask (!%p112_p2), 1045504   ;;  %v289_v0 = vmov (!%p112_p2), 0.0   ;;  %v280_v1 = vld [vmem:[%s327_s1] sm:$0x3f] (!%p112_p2)   ;;  %p131_p3 = scmp.lt.s32.totalorder (!%p112_p2), %s251_s10, 1  ;;  %vm290_vm1 = vmmov (!%p112_p2), 0  }
   0x6   : > { %115 = sbr.rel (%p112_p2) target bundleno = 234 (0xea), region = 28  ;;  %264 = vmatprep.subr.bf16.mxu0 (!%p112_p2), %v289_v0  ;;  %266 = vmatprep.mubr.msk.bf16.mxu0 (!%p112_p2), %vm290_vm1, %v289_v0  ;;  %v155_v2 = vsel (!%p112_p2), %vm153_vm0, %v280_v1, 0  ;;  %vm149_vm2 = vcmask (!%p112_p2), 97280  }
   0x7   : > { %265 = vmatpush3.bf16.msra.mxu0 (!%p112_p2), %v155_v2 }
   0xd   : > { %s330_s10 = smov (!%p131_p3, %s251_s10), 1 }
   0xe   : > { %s256_s13 = sshll.u32 %s330_s10, 3 }
   0xf   : > { %s134_s16 = scalar_lea.vmem %s326_s0, %s256_s13  ;;  %s138_s19 = scalar_lea.vmem %s328_s2, %s256_s13 }
  0x10   : > { %v140_v3 = vld [vmem:[%s134_s16] sm:$0xff] }
  0x11   : > { %v143_v4 = vpack.c.bf16 %v140_v3, %v140_v3 }
  0x13   : > { %267 = vmatmul.mubr.msk.bf16.vlgmr.msra.gmra.mrb[0].mxu0 %vm149_vm2, %v143_v4 }
  0xe6   : > { %v191_v5 = vpop.f32.mrb[0].mxu0 }
  0xe7   : > { %197 = vst.msk [vmem:[%s138_s19] sm:$0xff] %vm149_vm2, %v191_v5  ;;  %v268_v6 = vpop.f32.mrb[1].mxu0 }
  0xe8   : > { %v194_v7 = vpop.f32.mrb[2].mxu0 }
  0xe9   : > { %v269_v8 = vpop.f32.mrb[3].mxu0 }
  0xea PF: > { %s12_s9 = sadd.s32 1, %s287_s9  }
  0xeb   : > { %p9_p4 = scmp.ge.s32.totalorder %s12_s9, 4  }
  0xed   :  { %11 = sbr.rel (!%p9_p4) target bundleno = 1 (0x1), region = 58 }

</bundles_post_ra>
